<compile_context>
chip_gen: v6e
topology: v6e:2x2x1
jax: 0.10.0
libtpu: 0.0.40
codegen_flags: <defaults>
</compile_context>

<pallas_src>
import functools

import jax
import jax.numpy as jnp
from jax.experimental import pallas as pl
from jax.experimental.pallas import tpu as pltpu


def _round_up(x, m):
    return (x + m - 1) // m * m


# Tile caps (upper bounds; actual tiles are divisors of the padded dims).
_TM_CAP = 256     # sublane-dim cap (multiple of 8)
_TN_CAP = 1024    # output lane-dim cap (multiple of 128)
_TK_CAP = 1024    # contraction-dim cap (multiple of 128)

_VMEM_LIMIT = 48 * 1024 * 1024   # fits v7x (64 MiB/TC); generous for v5e/v6e


def _pick_tile(dim_padded, cap, granule):
    """Largest multiple of `granule` <= min(cap, dim_padded) dividing dim_padded.

    `dim_padded` is itself a multiple of `granule`, so `granule` is always a
    valid fallback -> no work inflation beyond bare alignment.
    """
    cap = min(cap, dim_padded)
    t = cap - cap % granule
    while t > granule:
        if dim_padded % t == 0:
            return t
        t -= granule
    return granule


def _encoder_kernel(x_ref, w_ref, b_ref, o_ref):
    """One (tm, tn) output tile; grid axis 2 walks the K (contraction) dim.

    The output tile doubles as the f32 accumulator: its block index (i, j) is
    k-invariant, so it stays resident in VMEM across all K steps.
    """
    k = pl.program_id(2)

    @pl.when(k == 0)
    def _():
        # Accumulator starts at the (broadcast) bias -> no epilogue add.
        o_ref[...] = jnp.broadcast_to(b_ref[...], o_ref.shape)

    # In-kernel bf16 cast of the f32 activation tile; MXU bf16 x bf16 -> f32.
    o_ref[...] += jnp.dot(x_ref[...].astype(jnp.bfloat16), w_ref[...],
                          preferred_element_type=jnp.float32)

    @pl.when(k == pl.num_programs(2) - 1)
    def _():
        # ReLU in place; store stays f32 and lane-dense (unmasked vst).
        o_ref[...] = jnp.maximum(o_ref[...], 0.0)
        # TODO(synk): training-mode dropout (pltpu.prng_random_bits mask)
        #             omitted; nn.Dropout is identity at inference.


def prepare_params(w, b, compute_dtype=jnp.bfloat16):
    """One-time parameter prep (keep OFF the per-step hot path):
    transpose fc.weight (H, D_in) -> (D_in, H), zero-pad to 128 multiples,
    cast weight to the MXU compute dtype; bias stays f32 with shape (1, N_pad).

    Padding is pure lane/sublane alignment (round to 128) and does NOT depend
    on tile constants -- tile selection later always divides these dims.
    """
    hidden, d_in = w.shape
    k_pad = _round_up(d_in, 128)
    n_pad = _round_up(hidden, 128)
    w_t = jnp.zeros((k_pad, n_pad), dtype=compute_dtype)
    w_t = w_t.at[:d_in, :hidden].set(jnp.transpose(w).astype(compute_dtype))
    b_p = jnp.zeros((1, n_pad), dtype=jnp.float32)
    b_p = b_p.at[0, :hidden].set(b.astype(jnp.float32))
    return w_t, b_p


@functools.partial(jax.jit, static_argnames=("hidden_dim",))
def encoder_technical(x, w_t_padded, b_padded, hidden_dim):
    """x: (B, D_in) f32; w_t_padded: (K_pad, N_pad) bf16 from prepare_params;
    b_padded: (1, N_pad) f32.  Returns (B, hidden_dim) f32 = ReLU(x W^T + b)."""
    batch, d_in = x.shape
    k_pad, n_pad = w_t_padded.shape

    # Loud failure instead of silent tail-dropping if params weren't prepared
    # by prepare_params / are mis-shaped.
    assert k_pad % 128 == 0 and n_pad % 128 == 0, (k_pad, n_pad)
    assert k_pad >= d_in and n_pad >= hidden_dim, (k_pad, d_in, n_pad, hidden_dim)

    m_pad = _round_up(batch, 8)

    tm = _pick_tile(m_pad, _TM_CAP, 8)
    tn = _pick_tile(n_pad, _TN_CAP, 128)
    tk = _pick_tile(k_pad, _TK_CAP, 128)

    # v7x: make sure >= 2 "parallel" grid blocks exist so the 2nd TC isn't idle.
    if m_pad // tm == 1 and n_pad // tn == 1 and tn >= 256 and tn % 256 == 0:
        tn //= 2

    assert m_pad % tm == 0 and n_pad % tn == 0 and k_pad % tk == 0, (
        (m_pad, tm), (n_pad, tn), (k_pad, tk))

    # Pad x only when genuinely unaligned (stays f32; bf16 cast is in-kernel).
    pad_m, pad_k = m_pad - batch, k_pad - d_in
    x_p = x if (pad_m == 0 and pad_k == 0) else jnp.pad(x, ((0, pad_m), (0, pad_k)))

    grid = (m_pad // tm, n_pad // tn, k_pad // tk)

    cost = pl.CostEstimate(
        flops=2 * m_pad * n_pad * k_pad,
        transcendentals=0,
        bytes_accessed=(m_pad * k_pad * 4        # x (f32 read)
                        + k_pad * n_pad * 2      # W^T (bf16 read)
                        + n_pad * 4              # bias
                        + m_pad * n_pad * 4),    # out (f32 write)
    )

    out = pl.pallas_call(
        _encoder_kernel,
        out_shape=jax.ShapeDtypeStruct((m_pad, n_pad), jnp.float32),
        grid=grid,
        in_specs=[
            pl.BlockSpec((tm, tk), lambda i, j, k: (i, k)),   # x (f32)
            pl.BlockSpec((tk, tn), lambda i, j, k: (k, j)),   # W^T (bf16)
            pl.BlockSpec((1, tn), lambda i, j, k: (0, j)),    # bias (f32)
        ],
        out_specs=pl.BlockSpec((tm, tn), lambda i, j, k: (i, j)),
        compiler_params=pltpu.CompilerParams(
            dimension_semantics=("parallel", "parallel", "arbitrary"),
            vmem_limit_bytes=_VMEM_LIMIT,
        ),
        cost_estimate=cost,
    )(x_p, w_t_padded, b_padded)

    # Skip the post-kernel slice entirely when the slab is already exact.
    if batch == m_pad and hidden_dim == n_pad:
        return out
    return out[:batch, :hidden_dim]


if __name__ == "__main__":
    # Shapes consistent with the module: batch=8, input_dim=16, hidden_dim=32.
    B, D_IN, HID = 8, 16, 32

    key = jax.random.PRNGKey(0)
    kx, kw, kb = jax.random.split(key, 3)

    x = jax.random.normal(kx, (B, D_IN), dtype=jnp.float32)

    # Deterministic init mimicking nn.Linear's uniform(-1/sqrt(fan_in), +).
    bound = 1.0 / (D_IN ** 0.5)
    w = jax.random.uniform(kw, (HID, D_IN), minval=-bound, maxval=bound,
                           dtype=jnp.float32)            # fc.weight (H, D_in)
    b = jax.random.uniform(kb, (HID,), minval=-bound, maxval=bound,
                           dtype=jnp.float32)            # fc.bias   (H,)

    # One-time parameter prep (transpose + pad + bf16 cast) -- off the hot path.
    w_t_p, b_p = prepare_params(w, b)

    out = encoder_technical(x, w_t_p, b_p, hidden_dim=HID)
    out = jax.block_until_ready(out)

    # Reference: same bf16-rounded operands, f32 math (matches MXU bf16->f32 acc).
    x_bf = x.astype(jnp.bfloat16).astype(jnp.float32)
    w_bf = jnp.transpose(w).astype(jnp.bfloat16).astype(jnp.float32)
    ref = jnp.maximum(x_bf @ w_bf + b.reshape(1, HID), 0.0)

    assert out.shape == (B, HID)
    assert jnp.allclose(out, ref, atol=1e-4, rtol=1e-4), float(
        jnp.max(jnp.abs(out - ref)))

    print("KERNEL_OK")
</pallas_src>

<mosaic_0001>
module attributes {stable_mosaic.version = 11 : i64} {
  func.func @_encoder_kernel(%arg0: i32, %arg1: i32, %arg2: i32, %arg3: memref<8x128xf32, #tpu.memory_space<vmem>>, %arg4: memref<128x128xbf16, #tpu.memory_space<vmem>>, %arg5: memref<1x128xf32, #tpu.memory_space<vmem>>, %arg6: memref<8x128xf32, #tpu.memory_space<vmem>>) attributes {dimension_semantics = [#tpu.dimension_semantics<parallel>, #tpu.dimension_semantics<parallel>, #tpu.dimension_semantics<arbitrary>], iteration_bounds = array<i64: 1, 1, 1>, scalar_prefetch = 0 : i64, scratch_operands = 0 : i64, tpu.core_type = #tpu.core_type<tc>, window_params = [{transform_indices = @transform_0, window_bounds = array<i64: 8, 128>}, {transform_indices = @transform_1, window_bounds = array<i64: 128, 128>}, {transform_indices = @transform_2, window_bounds = array<i64: 1, 128>}, {transform_indices = @transform_3, window_bounds = array<i64: 8, 128>}]} {
    %c0_i32 = arith.constant 0 : i32
    %0 = arith.cmpi eq, %arg2, %c0_i32 : i32
    %1 = arith.extui %0 : i1 to i32
    %c0_i32_0 = arith.constant 0 : i32
    %2 = arith.cmpi ne, %1, %c0_i32_0 : i32
    scf.if %2 {
      %c0_10 = arith.constant 0 : index
      %c0_11 = arith.constant 0 : index
      %13 = vector.load %arg5[%c0_10, %c0_11] : memref<1x128xf32, #tpu.memory_space<vmem>>, vector<1x128xf32>
      %14 = vector.shape_cast %13 : vector<1x128xf32> to vector<1x128xf32>
      %15 = vector.broadcast %14 : vector<1x128xf32> to vector<8x128xf32>
      %c0_12 = arith.constant 0 : index
      %c0_13 = arith.constant 0 : index
      %16 = vector.load %arg6[%c0_12, %c0_13] : memref<8x128xf32, #tpu.memory_space<vmem>>, vector<8x128xf32>
      tpu.vector_store %arg6[%c0_12, %c0_13], %15 {strides = array<i32>} : memref<8x128xf32, #tpu.memory_space<vmem>>, vector<8x128xf32>,
    } else {
    }
    %c0 = arith.constant 0 : index
    %c0_1 = arith.constant 0 : index
    %3 = vector.load %arg6[%c0, %c0_1] : memref<8x128xf32, #tpu.memory_space<vmem>>, vector<8x128xf32>
    %c0_2 = arith.constant 0 : index
    %c0_3 = arith.constant 0 : index
    %4 = vector.load %arg3[%c0_2, %c0_3] : memref<8x128xf32, #tpu.memory_space<vmem>>, vector<8x128xf32>
    %5 = arith.truncf %4 : vector<8x128xf32> to vector<8x128xbf16>
    %c0_4 = arith.constant 0 : index
    %c0_5 = arith.constant 0 : index
    %6 = vector.load %arg4[%c0_4, %c0_5] : memref<128x128xbf16, #tpu.memory_space<vmem>>, vector<128x128xbf16>
    %cst = arith.constant dense<0.000000e+00> : vector<8x128xf32>
    %7 = tpu.matmul %5, %6, %cst {dimension_numbers = #tpu.dot_dimension_numbers<[1], [0], [0], [1], [0, 0, 1, 1], [], []>} : vector<8x128xbf16>, vector<128x128xbf16>, vector<8x128xf32> -> vector<8x128xf32>
    %8 = arith.addf %3, %7 : vector<8x128xf32>
    %c0_6 = arith.constant 0 : index
    %c0_7 = arith.constant 0 : index
    %9 = vector.load %arg6[%c0_6, %c0_7] : memref<8x128xf32, #tpu.memory_space<vmem>>, vector<8x128xf32>
    tpu.vector_store %arg6[%c0_6, %c0_7], %8 {strides = array<i32>} : memref<8x128xf32, #tpu.memory_space<vmem>>, vector<8x128xf32>,
    %c0_i32_8 = arith.constant 0 : i32
    %10 = arith.cmpi eq, %arg2, %c0_i32_8 : i32
    %11 = arith.extui %10 : i1 to i32
    %c0_i32_9 = arith.constant 0 : i32
    %12 = arith.cmpi ne, %11, %c0_i32_9 : i32
    scf.if %12 {
      %c0_10 = arith.constant 0 : index
      %c0_11 = arith.constant 0 : index
      %13 = vector.load %arg6[%c0_10, %c0_11] : memref<8x128xf32, #tpu.memory_space<vmem>>, vector<8x128xf32>
      %cst_12 = arith.constant 0.000000e+00 : f32
      %14 = vector.broadcast %cst_12 : f32 to vector<8x128xf32>
      %15 = arith.maximumf %13, %14 : vector<8x128xf32>
      %c0_13 = arith.constant 0 : index
      %c0_14 = arith.constant 0 : index
      %16 = vector.load %arg6[%c0_13, %c0_14] : memref<8x128xf32, #tpu.memory_space<vmem>>, vector<8x128xf32>
      tpu.vector_store %arg6[%c0_13, %c0_14], %15 {strides = array<i32>} : memref<8x128xf32, #tpu.memory_space<vmem>>, vector<8x128xf32>,
    } else {
    }
    return
  }
  func.func @transform_0(%arg0: i32, %arg1: i32, %arg2: i32) -> (i32, i32) {
    %c0_i32 = arith.constant 0 : i32
    return %arg0, %arg2 : i32, i32
  }
  func.func @transform_1(%arg0: i32, %arg1: i32, %arg2: i32) -> (i32, i32) {
    %c0_i32 = arith.constant 0 : i32
    return %arg2, %arg1 : i32, i32
  }
  func.func @transform_2(%arg0: i32, %arg1: i32, %arg2: i32) -> (i32, i32) {
    %c0_i32 = arith.constant 0 : i32
    %c0_i32_0 = arith.constant 0 : i32
    return %c0_i32, %arg1 : i32, i32
  }
  func.func @transform_3(%arg0: i32, %arg1: i32, %arg2: i32) -> (i32, i32) {
    %c0_i32 = arith.constant 0 : i32
    return %arg0, %arg1 : i32, i32
  }
}

</mosaic_0001>

<bundles_post_ra>
// kernel: encoder_technical.1
= control target key start
LH: loop header
LB: loop body
LE: loop exit
PB: predicated region body
PF: predicated region fallthrough
CT: control target
= control target key end

     0   :  { %8 = vsyncpa [#allocation3], 0  ;;  %s306_s0 = inlined_call_operand.vmem [shape: f32[8,128], index: 0, kind: input, shape index: {}]   ;;  %s307_s1 = inlined_call_operand.hbm [shape: bf16[128,128], index: 1, kind: input, shape index: {}]   ;;  %s308_s2 = inlined_call_operand.vmem [shape: f32[1,128], index: 2, kind: input, shape index: {}]   ;;  %s309_s3 = inlined_call_operand.hbm [shape: f32[8,128], index: 3, kind: output, shape index: {}]  }
   0x1   :  { %9 = vsyncpa [#allocation4], 0  ;;  %s268_s12 = smov [#allocation2]  }
   0x2   :  { %s17_s13 = sshll.u32 %s268_s12, 4  ;;  %s18_s13 = int_to_ptr.vmem [resolvable:$true] %s17_s13 }
   0x3   :  { %s232_s14 = scalar_lea.vmem %s18_s13, 1024  ;;  %p237_p1 = scmp.lt.s32.totalorder %s18_s13, %s18_s13 }
   0x4   :  { %p233_p0 = scmp.ne.s32.totalorder %s18_s13, %s232_s14  ;;  %p238_p2 = scmp.lt.s32.totalorder %s232_s14, %s232_s14 }
   0x6   :  { %p239_p3 = por %p238_p2, %p237_p1 }
   0x8   :  { %p240_p4 = pnand %p239_p3, %p233_p0 }
   0xa   :  { %243 = shalt.err (!%p240_p4)
}
   0xb   :  { %s269_s15 = smov 64   ;;  %s270_s16 = smov 4  }
   0xc   :  { %23 = dma.hbm_to_vmem [thread:$0]  %s307_s1, 1024, %s18_s13, [#allocation3], %s269_s15, %s269_s15, %s270_s16  }
   0xd   :  { %264 = dma.done.wait [#allocation3], 1024  }
   0xe   :  { %265 = vsyncadd [#allocation3], 4294966272  ;;  %v271_v0 = vmov 0.0   ;;  %vm272_vm0 = vmmov 0   ;;  %v216_v1 = vld [vmem:[#allocation2 + $0x38] sm:$0xff]   ;;  %v217_v2 = vld [vmem:[#allocation2 + $0x30] sm:$0xff]  }
   0xf   :  { %190 = vmatprep.subr.bf16.mxu0 %v271_v0  ;;  %206 = vmatprep.mubr.msk.bf16.mxu0 %vm272_vm0, %v271_v0  ;;  %v218_v3 = vld [vmem:[#allocation2 + $0x28] sm:$0xff]   ;;  %v219_v4 = vld [vmem:[#allocation2 + $0x20] sm:$0xff]   ;;  %v220_v5 = vld [vmem:[#allocation2 + $0x18] sm:$0xff]   ;;  %s273_s22 = smov [#allocation5]  }
  0x10   :  { %191 = vmatpush3.bf16.msra.mxu0 %v216_v1  ;;  %v221_v6 = vld [vmem:[#allocation2 + $0x10] sm:$0xff]   ;;  %v222_v7 = vld [vmem:[#allocation2 + $0x8] sm:$0xff]   ;;  %v223_v8 = vld [vmem:[#allocation2] sm:$0xff]   ;;  %s163_s23 = sshll.u32 %s273_s22, 4  ;;  %s164_s23 = int_to_ptr.vmem [resolvable:$true] %s163_s23 }
  0x11   :  { %192 = vmatprep.subr.bf16.mxu0 %v271_v0  ;;  %v43_v9 = vld [vmem:[%s306_s0] sm:$0xff]  ;;  %s244_s24 = scalar_lea.vmem %s164_s23, 128  ;;  %p249_p6 = scmp.lt.s32.totalorder %s164_s23, %s164_s23 }
  0x12   :  { %v44_v10 = vpack.c.bf16 %v43_v9, %v43_v9  ;;  %v172_v11 = vld [vmem:[%s308_s2] ss:$0 sm:$0xff]  ;;  %p245_p5 = scmp.ne.s32.totalorder %s164_s23, %s244_s24  ;;  %p250_p7 = scmp.lt.s32.totalorder %s244_s24, %s244_s24 }
  0x14   :  { %193 = vmatpush3.bf16.msra.mxu0 %v217_v2  ;;  %p251_p8 = por %p250_p7, %p249_p6 }
  0x15   :  { %194 = vmatprep.subr.bf16.mxu0 %v271_v0 }
  0x16   :  { %p252_p9 = pnand %p251_p8, %p245_p5 }
  0x18   :  { %195 = vmatpush3.bf16.msra.mxu0 %v218_v3 }
  0x19   :  { %196 = vmatprep.subr.bf16.mxu0 %v271_v0 }
  0x1c   :  { %197 = vmatpush3.bf16.msra.mxu0 %v219_v4 }
  0x1d   :  { %198 = vmatprep.subr.bf16.mxu0 %v271_v0 }
  0x20   :  { %199 = vmatpush3.bf16.msra.mxu0 %v220_v5 }
  0x21   :  { %200 = vmatprep.subr.bf16.mxu0 %v271_v0 }
  0x24   :  { %201 = vmatpush3.bf16.msra.mxu0 %v221_v6 }
  0x25   :  { %202 = vmatprep.subr.bf16.mxu0 %v271_v0 }
  0x28   :  { %203 = vmatpush3.bf16.msra.mxu0 %v222_v7 }
  0x29   :  { %204 = vmatprep.subr.bf16.mxu0 %v271_v0 }
  0x2c   :  { %205 = vmatpush3.bf16.msra.mxu0 %v223_v8 }
  0x2f   :  { %207 = vmatmul.mubr.bf16.vlgmr.msra.gmra.mxu0 %v44_v10 }
  0xef   :  { %v143_v12 = vpop.f32.mrf.mxu0 }
  0xf0   :  { %v149_v13 = vadd.f32 %v172_v11, %v143_v12 }
  0xf1   :  { %v208_v14 = vpop.f32.mrf.mxu0 }
  0xf2   :  { %v155_v15 = vmax.f32 %v149_v13, 0.0 }
  0xf3   :  { %v146_v16 = vpop.f32.mrf.mxu0 }
  0xf4   :  { %156 = vst [vmem:[#allocation5] sm:$0xff] %v155_v15 }
  0xf5   :  { %v209_v17 = vpop.f32.mrf.mxu0 }
  0xf6   :  { %255 = shalt.err (!%p252_p9)
}
  0xf7   :  { %166 = dma.vmem_to_hbm [thread:$0]  %s164_s23, 128, %s309_s3, [#allocation4]  }
  0xf8   :  { %266 = dma.done.wait [#allocation4], 128  }
  0xf9   :  { %267 = vsyncadd [#allocation4], 4294967168 }
  0xfa   :  { %170 = vsyncpa [#allocation3], 1 }
  0xfb   :  { %171 = vsyncpa [#allocation4], 1 }

</bundles_post_ra>
